<compile_context>
chip_gen: v7x
topology: tpu7x:2x2x1
jax: 0.10.0
libtpu: 0.0.40
codegen_flags: <defaults>
</compile_context>

<pallas_src>
import functools
import math

import jax
import jax.numpy as jnp
from jax import lax
from jax.experimental import pallas as pl
from jax.experimental.pallas import tpu as pltpu

BN_EPS = 1e-5


# ---------------- Kernel: im2col conv3x3 + bias + ReLU + per-tile BN partial sums ----------------
def _conv_relu_stats_kernel(x_ref, w_ref, b_ref, y_ref, psum_ref, psq_ref,
                            *, m_total, m_tile, needs_mask):
    # x_ref:    (MT, Kp)     bf16 im2col patch rows (K zero-padded to 128 lanes, tail rows zero)
    # w_ref:    (Kp, Cout)   bf16 conv weight, grid-invariant
    # b_ref:    (1, Cout)    f32 bias
    # y_ref:    (MT, Cout)   f32 conv + bias + ReLU output rows
    # psum_ref: (1, 1, Cout) f32 per-tile partial sum   (for BN batch mean)
    # psq_ref:  (1, 1, Cout) f32 per-tile partial sum of squares (for BN batch var)
    acc = jnp.dot(x_ref[...], w_ref[...], preferred_element_type=jnp.float32)  # MXU, f32 acc
    y = jnp.maximum(acc + b_ref[...], 0.0)                                      # bias + ReLU (f32)
    y_ref[...] = y

    if needs_mask:  # static: only when N*H*W is not a multiple of the row tile
        row = pl.program_id(0) * m_tile + lax.broadcasted_iota(jnp.int32, y.shape, 0)
        y = jnp.where(row < m_total, y, 0.0)
    psum_ref[0] = jnp.sum(y, axis=0, keepdims=True)
    psq_ref[0] = jnp.sum(y * y, axis=0, keepdims=True)


# ---------------- Wrapper -------------------------------------------------------------------------
@jax.jit
def conv_relu_forward(x_nchw, weight_oihw, bias, gamma, beta):
    """ConvRelu forward. x_nchw: (N, Cin, H, W) f32 -> (N, Cout, H, W) f32."""
    N, Cin, H, W = x_nchw.shape
    Cout = weight_oihw.shape[0]
    M = N * H * W
    K = 9 * Cin

    # im2col in the wrapper: fuses with the unavoidable NCHW->NHWC relayout under jit.
    x = jnp.transpose(x_nchw, (0, 2, 3, 1)).astype(jnp.float32)
    xp = jnp.pad(x, ((0, 0), (1, 1), (1, 1), (0, 0)))                       # padding=1
    patches = jnp.stack([xp[:, dh:dh + H, dw:dw + W, :]
                         for dh in range(3) for dw in range(3)], axis=3)    # (N,H,W,9,Cin)
    patches = patches.reshape(M, K)

    # Weight OIHW -> (kh, kw, Cin, Cout) -> (9*Cin, Cout); same K ordering as the patches.
    w_mat = jnp.transpose(weight_oihw, (2, 3, 1, 0)).reshape(K, Cout)

    # Lane-dense K (zero pad to a multiple of 128) and 256-row M tiles.
    Kp = ((K + 127) // 128) * 128
    MT = 256 if M >= 256 else ((M + 7) // 8) * 8
    n_tiles = pl.cdiv(M, MT)
    Mp = n_tiles * MT

    patches = jnp.pad(patches, ((0, Mp - M), (0, Kp - K))).astype(jnp.bfloat16)
    w_mat = jnp.pad(w_mat, ((0, Kp - K), (0, 0))).astype(jnp.bfloat16)
    bias_row = bias.astype(jnp.float32).reshape(1, Cout)

    kernel = functools.partial(_conv_relu_stats_kernel,
                               m_total=M, m_tile=MT, needs_mask=(Mp != M))

    y_pad, psum, psq = pl.pallas_call(
        kernel,
        out_shape=(
            jax.ShapeDtypeStruct((Mp, Cout), jnp.float32),
            jax.ShapeDtypeStruct((n_tiles, 1, Cout), jnp.float32),
            jax.ShapeDtypeStruct((n_tiles, 1, Cout), jnp.float32),
        ),
        grid_spec=pltpu.PrefetchScalarGridSpec(
            num_scalar_prefetch=0,
            grid=(n_tiles,),
            in_specs=[
                pl.BlockSpec((MT, Kp), lambda m: (m, 0)),      # im2col row tile
                pl.BlockSpec((Kp, Cout), lambda m: (0, 0)),    # resident weight (grid-invariant)
                pl.BlockSpec((1, Cout), lambda m: (0, 0)),     # resident bias
            ],
            out_specs=[
                pl.BlockSpec((MT, Cout), lambda m: (m, 0)),
                pl.BlockSpec((1, 1, Cout), lambda m: (m, 0, 0)),   # per-tile partials -> parallel
                pl.BlockSpec((1, 1, Cout), lambda m: (m, 0, 0)),
            ],
        ),
        compiler_params=pltpu.CompilerParams(
            dimension_semantics=("parallel",),
            vmem_limit_bytes=32 * 1024 * 1024,   # explicit budget: fits v5e/v6e/v7x alike
        ),
    )(patches, w_mat, bias_row)

    # BatchNorm2d training-mode batch statistics (biased variance) - tiny scalar glue in JAX.
    mean = psum.sum(axis=(0, 1)) / M
    ex2 = psq.sum(axis=(0, 1)) / M
    var = jnp.maximum(ex2 - mean * mean, 0.0)
    inv_std = lax.rsqrt(var + BN_EPS)
    scale = gamma.astype(jnp.float32) * inv_std
    shift = beta.astype(jnp.float32) - mean * scale

    # BN affine apply + Dropout(eval)=identity in plain JAX: XLA fuses this elementwise op into
    # the mandatory (M, Cout) -> NCHW reshape/transpose pass (no extra HBM round trip).
    y = y_pad[:M]
    out = y * scale[None, :] + shift[None, :]
    out = out.reshape(N, H, W, Cout)
    return jnp.transpose(out, (0, 3, 1, 2))


# ---------------- Reference (pure JAX) for sanity checks ------------------------------------------
def _reference(x_nchw, weight_oihw, bias, gamma, beta, bf16_operands):
    x = jnp.transpose(x_nchw, (0, 2, 3, 1))
    w = jnp.transpose(weight_oihw, (2, 3, 1, 0))
    if bf16_operands:   # matches the kernel's bf16-operand / f32-accumulate precision choice
        x = x.astype(jnp.bfloat16)
        w = w.astype(jnp.bfloat16)
    y = lax.conv_general_dilated(x, w, window_strides=(1, 1), padding="SAME",
                                 dimension_numbers=("NHWC", "HWIO", "NHWC"),
                                 preferred_element_type=jnp.float32)
    y = jnp.maximum(y + bias.astype(jnp.float32), 0.0)
    mean = y.mean(axis=(0, 1, 2))
    var = y.var(axis=(0, 1, 2))
    y = (y - mean) * lax.rsqrt(var + BN_EPS) * gamma + beta
    return jnp.transpose(y, (0, 3, 1, 2))


if __name__ == "__main__":
    key = jax.random.PRNGKey(0)
    N, Cin, Cout, H, W = 2, 4, 8, 16, 16

    kx, kw, kb = jax.random.split(key, 3)
    x = jax.random.normal(kx, (N, Cin, H, W), dtype=jnp.float32)

    # Deterministic PyTorch-style Conv2d init (kaiming_uniform(a=sqrt(5)) -> U(-1/sqrt(fan_in),.)).
    fan_in = Cin * 3 * 3
    bound = 1.0 / math.sqrt(fan_in)
    weight = jax.random.uniform(kw, (Cout, Cin, 3, 3), jnp.float32, -bound, bound)
    bias = jax.random.uniform(kb, (Cout,), jnp.float32, -bound, bound)
    gamma = jnp.ones((Cout,), jnp.float32)   # BatchNorm2d default weight
    beta = jnp.zeros((Cout,), jnp.float32)   # BatchNorm2d default bias

    out = jax.block_until_ready(conv_relu_forward(x, weight, bias, gamma, beta))

    # Tight check: reference with the same bf16-operand / f32-accumulate conv numerics.
    ref_bf16 = jax.block_until_ready(_reference(x, weight, bias, gamma, beta, True))
    if not jnp.allclose(out, ref_bf16, atol=1e-2, rtol=1e-2):
        raise AssertionError("Pallas ConvRelu does not match bf16-operand JAX reference")

    # Loose check: full-f32 reference (only difference is the bf16 cast of matmul operands).
    ref_f32 = jax.block_until_ready(_reference(x, weight, bias, gamma, beta, False))
    if not jnp.allclose(out, ref_f32, atol=1e-1, rtol=1e-1):
        raise AssertionError("Pallas ConvRelu deviates too much from f32 JAX reference")

    print("KERNEL_OK")
</pallas_src>

<mosaic_0001>
module attributes {stable_mosaic.version = 11 : i64} {
  func.func @_conv_relu_stats_kernel(%arg0: i32, %arg1: memref<256x128xbf16, #tpu.memory_space<vmem>>, %arg2: memref<128x8xbf16, #tpu.memory_space<vmem>>, %arg3: memref<1x8xf32, #tpu.memory_space<vmem>>, %arg4: memref<256x8xf32, #tpu.memory_space<vmem>>, %arg5: memref<1x1x8xf32, #tpu.memory_space<vmem>>, %arg6: memref<1x1x8xf32, #tpu.memory_space<vmem>>) attributes {dimension_semantics = [#tpu.dimension_semantics<parallel>], iteration_bounds = array<i64: 2>, scalar_prefetch = 0 : i64, scratch_operands = 0 : i64, tpu.core_type = #tpu.core_type<tc>, window_params = [{transform_indices = @transform_0, window_bounds = array<i64: 256, 128>}, {pipeline_mode = #tpu.pipeline_mode<synchronous>, transform_indices = @transform_1, window_bounds = array<i64: 128, 8>}, {pipeline_mode = #tpu.pipeline_mode<synchronous>, transform_indices = @transform_2, window_bounds = array<i64: 1, 8>}, {transform_indices = @transform_3, window_bounds = array<i64: 256, 8>}, {transform_indices = @transform_4, window_bounds = array<i64: 1, 1, 8>}, {transform_indices = @transform_5, window_bounds = array<i64: 1, 1, 8>}]} {
    %c0 = arith.constant 0 : index
    %c0_0 = arith.constant 0 : index
    %0 = vector.load %arg1[%c0, %c0_0] : memref<256x128xbf16, #tpu.memory_space<vmem>>, vector<256x128xbf16>
    %c0_1 = arith.constant 0 : index
    %c0_2 = arith.constant 0 : index
    %1 = vector.load %arg2[%c0_1, %c0_2] : memref<128x8xbf16, #tpu.memory_space<vmem>>, vector<128x8xbf16>
    %cst = arith.constant dense<0.000000e+00> : vector<256x8xf32>
    %2 = tpu.matmul %0, %1, %cst {dimension_numbers = #tpu.dot_dimension_numbers<[1], [0], [0], [1], [0, 0, 1, 1], [], []>} : vector<256x128xbf16>, vector<128x8xbf16>, vector<256x8xf32> -> vector<256x8xf32>
    %c0_3 = arith.constant 0 : index
    %c0_4 = arith.constant 0 : index
    %3 = vector.load %arg3[%c0_3, %c0_4] : memref<1x8xf32, #tpu.memory_space<vmem>>, vector<1x8xf32>
    %4 = vector.broadcast %3 : vector<1x8xf32> to vector<256x8xf32>
    %5 = arith.addf %2, %4 : vector<256x8xf32>
    %cst_5 = arith.constant 0.000000e+00 : f32
    %6 = vector.broadcast %cst_5 : f32 to vector<256x8xf32>
    %7 = arith.maximumf %5, %6 : vector<256x8xf32>
    %c0_6 = arith.constant 0 : index
    %c0_7 = arith.constant 0 : index
    %8 = vector.load %arg4[%c0_6, %c0_7] : memref<256x8xf32, #tpu.memory_space<vmem>>, vector<256x8xf32>
    tpu.vector_store %arg4[%c0_6, %c0_7], %7 {strides = array<i32>} : memref<256x8xf32, #tpu.memory_space<vmem>>, vector<256x8xf32>,
    %cst_8 = arith.constant dense<0.000000e+00> : vector<8xf32>
    %9 = vector.multi_reduction <add>, %7, %cst_8 [0] : vector<256x8xf32> to vector<8xf32>
    %10 = vector.shape_cast %9 : vector<8xf32> to vector<1x8xf32>
    %c0_9 = arith.constant 0 : index
    %c0_10 = arith.constant 0 : index
    %c0_11 = arith.constant 0 : index
    %11 = vector.load %arg5[%c0_9, %c0_10, %c0_11] : memref<1x1x8xf32, #tpu.memory_space<vmem>>, vector<1x1x8xf32>
    %12 = vector.shape_cast %11 : vector<1x1x8xf32> to vector<1x8xf32>
    %13 = vector.shape_cast %10 : vector<1x8xf32> to vector<1x1x8xf32>
    tpu.vector_store %arg5[%c0_9, %c0_10, %c0_11], %13 {strides = array<i32>} : memref<1x1x8xf32, #tpu.memory_space<vmem>>, vector<1x1x8xf32>,
    %14 = arith.mulf %7, %7 : vector<256x8xf32>
    %cst_12 = arith.constant dense<0.000000e+00> : vector<8xf32>
    %15 = vector.multi_reduction <add>, %14, %cst_12 [0] : vector<256x8xf32> to vector<8xf32>
    %16 = vector.shape_cast %15 : vector<8xf32> to vector<1x8xf32>
    %c0_13 = arith.constant 0 : index
    %c0_14 = arith.constant 0 : index
    %c0_15 = arith.constant 0 : index
    %17 = vector.load %arg6[%c0_13, %c0_14, %c0_15] : memref<1x1x8xf32, #tpu.memory_space<vmem>>, vector<1x1x8xf32>
    %18 = vector.shape_cast %17 : vector<1x1x8xf32> to vector<1x8xf32>
    %19 = vector.shape_cast %16 : vector<1x8xf32> to vector<1x1x8xf32>
    tpu.vector_store %arg6[%c0_13, %c0_14, %c0_15], %19 {strides = array<i32>} : memref<1x1x8xf32, #tpu.memory_space<vmem>>, vector<1x1x8xf32>,
    return
  }
  func.func @transform_0(%arg0: i32) -> (i32, i32) {
    %c0_i32 = arith.constant 0 : i32
    %c0_i32_0 = arith.constant 0 : i32
    return %arg0, %c0_i32 : i32, i32
  }
  func.func @transform_1(%arg0: i32) -> (i32, i32) {
    %c0_i32 = arith.constant 0 : i32
    %c0_i32_0 = arith.constant 0 : i32
    %c0_i32_1 = arith.constant 0 : i32
    return %c0_i32, %c0_i32_0 : i32, i32
  }
  func.func @transform_2(%arg0: i32) -> (i32, i32) {
    %c0_i32 = arith.constant 0 : i32
    %c0_i32_0 = arith.constant 0 : i32
    %c0_i32_1 = arith.constant 0 : i32
    return %c0_i32, %c0_i32_0 : i32, i32
  }
  func.func @transform_3(%arg0: i32) -> (i32, i32) {
    %c0_i32 = arith.constant 0 : i32
    %c0_i32_0 = arith.constant 0 : i32
    return %arg0, %c0_i32 : i32, i32
  }
  func.func @transform_4(%arg0: i32) -> (i32, i32, i32) {
    %c0_i32 = arith.constant 0 : i32
    %c0_i32_0 = arith.constant 0 : i32
    %c0_i32_1 = arith.constant 0 : i32
    return %arg0, %c0_i32, %c0_i32_0 : i32, i32, i32
  }
  func.func @transform_5(%arg0: i32) -> (i32, i32, i32) {
    %c0_i32 = arith.constant 0 : i32
    %c0_i32_0 = arith.constant 0 : i32
    %c0_i32_1 = arith.constant 0 : i32
    return %arg0, %c0_i32, %c0_i32_0 : i32, i32, i32
  }
}

</mosaic_0001>

<bundles_post_ra>
// kernel: conv_relu_forward.1
= control target key start
LH: loop header
LB: loop body
LE: loop exit
PB: predicated region body
PF: predicated region fallthrough
CT: control target
= control target key end

     0   :  { %s1144_s18 = smov 0   ;;  %s1463_s0 = inlined_call_operand.vmem [shape: bf16[512,128], index: 0, kind: input, shape index: {}]   ;;  %s1464_s1 = inlined_call_operand.vmem [shape: bf16[128,8], index: 1, kind: input, shape index: {}]   ;;  %s1465_s2 = inlined_call_operand.vmem [shape: f32[1,8], index: 2, kind: input, shape index: {}]   ;;  %s1466_s3 = inlined_call_operand.vmem [shape: f32[512,8], index: 3, kind: output, shape index: {0}]   ;;  %s1467_s4 = inlined_call_operand.vmem [shape: f32[2,1,8], index: 4, kind: output, shape index: {1}]   ;;  %s1468_s5 = inlined_call_operand.vmem [shape: f32[2,1,8], index: 5, kind: output, shape index: {2}]  }
   0x1 LB: > { %s1150_s19 = sadd.s32 4294967295, %s1112_s18   ;;  %p954_p0 = scmp.ge.s32.totalorder %s1112_s18, 1  ;;  %s1112_s18 = sphi %s1144_s18, %s16_s18  }
   0x2   : > { %p193_p1 = scmp.lt.s32.totalorder %s1112_s18, 3 }
   0x4   : > { %p194_p2 = pnand %p954_p0, %p193_p1 }
   0x5   : > { %v1082_v0 = vld [vmem:[%s1464_s1] sm:$0xff] (!%p194_p2)   ;;  %s955_s22 = sshll.u32 (!%p194_p2), %s1150_s19, 5  ;;  %v1083_v1 = vld [vmem:[%s1464_s1 + $0x8] sm:$0xff] (!%p194_p2)   ;;  %v1084_v2 = vld [vmem:[%s1464_s1 + $0x10] sm:$0xff] (!%p194_p2)   ;;  %vm638_vm0 = vcmask (!%p194_p2), 64512   ;;  %p239_p4 = scmp.lt.s32.totalorder (!%p194_p2), %s1150_s19, 1 }
   0x6   : > { %197 = sbr.rel (%p194_p2) target bundleno = 335 (0x14f), region = 32  ;;  %p228_p3 = scmp.lt.s32.totalorder (!%p194_p2), %s955_s22, 63  ;;  %1010 = vmatprep.subr.bf16.mxu0 (!%p194_p2), %v1082_v0  ;;  %1058 = vmatprep.subr.bf16.mxu1 (!%p194_p2), %v1082_v0  ;;  %v1085_v3 = vld [vmem:[%s1464_s1 + $0x18] sm:$0xff] (!%p194_p2)   ;;  %v1086_v5 = vld [vmem:[%s1464_s1 + $0x20] sm:$0xff] (!%p194_p2)   ;;  %v1087_v6 = vld [vmem:[%s1464_s1 + $0x28] sm:$0xff] (!%p194_p2)   ;;  %vm740_vm1 = vcmask (!%p194_p2), 57344  }
   0x7   : > { %1011 = vmatpush3.bf16.msra.mxu0 (!%p194_p2), %v1082_v0  ;;  %1066 = vmatpush3.bf16.msra.mxu1 (!%p194_p2), %v1082_v0  ;;  %v1088_v8 = vld [vmem:[%s1464_s1 + $0x30] sm:$0xff] (!%p194_p2)   ;;  %v1089_v9 = vld [vmem:[%s1464_s1 + $0x38] sm:$0xff] (!%p194_p2)   ;;  %v1206_v24 = vld [vmem:[%s1465_s2] ss:$0 sm:$0xff] (!%p194_p2) }
   0x8   : > { %1012 = vmatprep.subr.bf16.mxu0 (!%p194_p2), %v1083_v1  ;;  %1059 = vmatprep.subr.bf16.mxu1 (!%p194_p2), %v1083_v1 }
   0xb   : > { %1013 = vmatpush3.bf16.msra.mxu0 (!%p194_p2), %v1083_v1  ;;  %1067 = vmatpush3.bf16.msra.mxu1 (!%p194_p2), %v1083_v1 }
   0xc   : > { %1014 = vmatprep.subr.bf16.mxu0 (!%p194_p2), %v1084_v2  ;;  %1060 = vmatprep.subr.bf16.mxu1 (!%p194_p2), %v1084_v2 }
   0xd   : > { %s1470_s22 = smov (!%p228_p3, %s955_s22), 63  ;;  %s1472_s19 = smov (!%p239_p4, %s1150_s19), 1 }
   0xe   : > { %s956_s27 = sshll.u32 %s1470_s22, 2  ;;  %s958_s20 = sshll.u32 %s1470_s22, 3 }
   0xf   : > { %s1170_s30 = scalar_lea.vmem %s1463_s0, %s956_s27  ;;  %1015 = vmatpush3.bf16.msra.mxu0 %v1084_v2  ;;  %1068 = vmatpush3.bf16.msra.mxu1 %v1084_v2  ;;  %s1214_s24 = scalar_lea.vmem %s1466_s3, %s958_s20 }
  0x10   : > { %v1090_v4 = vld [vmem:[%s1170_s30] sm:$0xff]   ;;  %1016 = vmatprep.subr.bf16.mxu0 %v1085_v3  ;;  %1061 = vmatprep.subr.bf16.mxu1 %v1085_v3  ;;  %v1091_v10 = vld [vmem:[%s1170_s30 + $0x8] sm:$0xff]   ;;  %v1092_v12 = vld [vmem:[%s1170_s30 + $0x10] sm:$0xff]   ;;  %s241_s26 = scalar_lea.vmem %s1467_s4, %s1472_s19  ;;  %s244_s29 = scalar_lea.vmem %s1468_s5, %s1472_s19 }
  0x11   : > { %1026 = vmatprep.mubr.bf16.mxu0 %v1090_v4  ;;  %v1098_v7 = vld [vmem:[%s1170_s30 + $0x40] sm:$0xff]   ;;  %v1099_v11 = vld [vmem:[%s1170_s30 + $0x48] sm:$0xff]   ;;  %v1100_v13 = vld [vmem:[%s1170_s30 + $0x50] sm:$0xff]  }
  0x12   : > { %1042 = vmatprep.mubr.bf16.mxu1 %v1098_v7  ;;  %v1093_v14 = vld [vmem:[%s1170_s30 + $0x18] sm:$0xff]   ;;  %v1094_v16 = vld [vmem:[%s1170_s30 + $0x20] sm:$0xff]   ;;  %v1095_v18 = vld [vmem:[%s1170_s30 + $0x28] sm:$0xff]  }
  0x13   : > { %1017 = vmatpush3.bf16.msra.mxu0 %v1085_v3  ;;  %1069 = vmatpush3.bf16.msra.mxu1 %v1085_v3  ;;  %v1101_v15 = vld [vmem:[%s1170_s30 + $0x58] sm:$0xff]   ;;  %v1102_v17 = vld [vmem:[%s1170_s30 + $0x60] sm:$0xff]   ;;  %v1103_v19 = vld [vmem:[%s1170_s30 + $0x68] sm:$0xff]  }
  0x14   : > { %1018 = vmatprep.subr.bf16.mxu0 %v1086_v5  ;;  %1062 = vmatprep.subr.bf16.mxu1 %v1086_v5  ;;  %v1096_v20 = vld [vmem:[%s1170_s30 + $0x30] sm:$0xff]   ;;  %v1097_v22 = vld [vmem:[%s1170_s30 + $0x38] sm:$0xff]  }
  0x15   : > { %v1104_v21 = vld [vmem:[%s1170_s30 + $0x70] sm:$0xff]   ;;  %v1105_v23 = vld [vmem:[%s1170_s30 + $0x78] sm:$0xff]  }
  0x17   : > { %1019 = vmatpush3.bf16.msra.mxu0 %v1086_v5  ;;  %1070 = vmatpush3.bf16.msra.mxu1 %v1086_v5 }
  0x18   : > { %1020 = vmatprep.subr.bf16.mxu0 %v1087_v6  ;;  %1063 = vmatprep.subr.bf16.mxu1 %v1087_v6 }
  0x1b   : > { %1021 = vmatpush3.bf16.msra.mxu0 %v1087_v6  ;;  %1071 = vmatpush3.bf16.msra.mxu1 %v1087_v6 }
  0x1c   : > { %1022 = vmatprep.subr.bf16.mxu0 %v1088_v8  ;;  %1064 = vmatprep.subr.bf16.mxu1 %v1088_v8 }
  0x1f   : > { %1023 = vmatpush3.bf16.msra.mxu0 %v1088_v8  ;;  %1072 = vmatpush3.bf16.msra.mxu1 %v1088_v8 }
  0x20   : > { %1024 = vmatprep.subr.bf16.mxu0 %v1089_v9  ;;  %1065 = vmatprep.subr.bf16.mxu1 %v1089_v9 }
  0x23   : > { %1025 = vmatpush3.bf16.msra.mxu0 %v1089_v9  ;;  %1073 = vmatpush3.bf16.msra.mxu1 %v1089_v9 }
  0x26   : > { %1027 = vmatmul.mubr.bf16.vlgmr.msra.gmra.mrb[0].mxu0 %v1091_v10  ;;  %1043 = vmatmul.mubr.bf16.vlgmr.msra.gmra.mrb[0].mxu1 %v1099_v11 }
  0x27   : > { %1030 = vmatprep.mubr.bf16.mxu0 %v1092_v12  ;;  %1046 = vmatprep.mubr.bf16.mxu1 %v1100_v13 }
  0x2e   : > { %1031 = vmatmul.mubr.bf16.gmra.mrb[4].mxu0 %v1093_v14  ;;  %1047 = vmatmul.mubr.bf16.gmra.mrb[4].mxu1 %v1101_v15 }
  0x2f   : > { %1034 = vmatprep.mubr.bf16.mxu0 %v1094_v16  ;;  %1050 = vmatprep.mubr.bf16.mxu1 %v1102_v17 }
  0x36   : > { %1035 = vmatmul.mubr.bf16.gmra.mrb[8].mxu0 %v1095_v18  ;;  %1051 = vmatmul.mubr.bf16.gmra.mrb[8].mxu1 %v1103_v19 }
  0x37   : > { %1038 = vmatprep.mubr.bf16.mxu0 %v1096_v20  ;;  %1054 = vmatprep.mubr.bf16.mxu1 %v1104_v21 }
  0x3e   : > { %1039 = vmatmul.mubr.bf16.gmra.mrb[12].mxu0 %v1097_v22  ;;  %1055 = vmatmul.mubr.bf16.gmra.mrb[12].mxu1 %v1105_v23 }
  0xf9   : > { %v1028_v25 = vpop.f32.mrb[0].mxu0  ;;  %v1044_v26 = vpop.f32.mrb[0].mxu1 }
  0xfa   : > { %v488_v27 = vadd.f32 %v1028_v25, %v1206_v24  ;;  %v479_v28 = vpop.f32.mrb[1].mxu0  ;;  %v552_v29 = vadd.f32 %v1044_v26, %v1206_v24  ;;  %v543_v30 = vpop.f32.mrb[1].mxu1 }
  0xfb   : > { %v480_v31 = vadd.f32 %v1206_v24, %v479_v28  ;;  %v1029_v32 = vpop.f32.mrb[2].mxu0  ;;  %v544_v33 = vadd.f32 %v1206_v24, %v543_v30  ;;  %v1045_v34 = vpop.f32.mrb[2].mxu1 }
  0xfc   : > { %v608_v35 = vmax.f32 %v488_v27, 0.0  ;;  %v491_v36 = vadd.f32 %v1029_v32, %v1206_v24  ;;  %v482_v37 = vpop.f32.mrb[3].mxu0  ;;  %v1219_v38 = vmax.f32 %v552_v29, 0.0  ;;  %v546_v39 = vpop.f32.mrb[3].mxu1  ;;  %v555_v46 = vadd.f32 %v1045_v34, %v1206_v24 }
  0xfd   : > { %v606_v40 = vmax.f32 %v480_v31, 0.0  ;;  %v483_v41 = vadd.f32 %v1206_v24, %v482_v37  ;;  %v1222_v42 = vmax.f32 %v544_v33, 0.0  ;;  %v547_v47 = vadd.f32 %v1206_v24, %v546_v39 }
  0xfe   : > { %641 = vst.msk [vmem:[%s1214_s24 + $0x10] sm:$0xff] %vm638_vm0, %v608_v35  ;;  %v609_v43 = vmax.f32 %v491_v36, 0.0  ;;  %657 = vst.msk [vmem:[%s1214_s24 + $0x90] sm:$0xff] %vm638_vm0, %v1219_v38  ;;  %v674_v48 = vsel %vm638_vm0, %v608_v35, 0.0  ;;  %v744_v49 = vmul.f32 %v608_v35, %v608_v35  ;;  %v1251_v0 = vmax.f32 %v555_v46, 0.0 }
  0xff   : > { %639 = vst.msk [vmem:[%s1214_s24] sm:$0xff] %vm638_vm0, %v606_v40  ;;  %v742_v44 = vmul.f32 %v606_v40, %v606_v40  ;;  %v607_v45 = vmax.f32 %v483_v41, 0.0  ;;  %655 = vst.msk [vmem:[%s1214_s24 + $0x80] sm:$0xff] %vm638_vm0, %v1222_v42  ;;  %v671_v50 = vsel %vm638_vm0, %v606_v40, 0.0  ;;  %v1253_v1 = vmax.f32 %v547_v47, 0.0 }
 0x100   : > { %642 = vst.msk [vmem:[%s1214_s24 + $0x18] sm:$0xff] %vm638_vm0, %v609_v43  ;;  %v745_v56 = vmul.f32 %v609_v43, %v609_v43  ;;  %v777_v9 = vsel %vm638_vm0, %v744_v49, 0.0  ;;  %v676_v10 = vsel %vm638_vm0, %v609_v43, 0.0  ;;  %658 = vst.msk [vmem:[%s1214_s24 + $0x98] sm:$0xff] %vm638_vm0, %v1251_v0 }
 0x101   : > { %640 = vst.msk [vmem:[%s1214_s24 + $0x8] sm:$0xff] %vm638_vm0, %v607_v45  ;;  %v672_v51 = vsel %vm638_vm0, %v607_v45, 0.0  ;;  %v743_v52 = vmul.f32 %v607_v45, %v607_v45  ;;  %v1032_v53 = vpop.f32.mrb[4].mxu0  ;;  %v1243_v54 = vpop.f32.mrb[4].mxu1  ;;  %v774_v55 = vsel %vm638_vm0, %v742_v44, 0.0  ;;  %656 = vst.msk [vmem:[%s1214_s24 + $0x88] sm:$0xff] %vm638_vm0, %v1253_v1 }
 0x102   : > { %v673_v57 = vadd.f32 %v672_v51, %v671_v50  ;;  %v504_v58 = vadd.f32 %v1032_v53, %v1206_v24  ;;  %v495_v59 = vpop.f32.mrb[5].mxu0  ;;  %v1247_v60 = vpop.f32.mrb[5].mxu1  ;;  %v779_v13 = vsel %vm638_vm0, %v745_v56, 0.0 }
 0x103   : > { %v775_v61 = vsel %vm638_vm0, %v743_v52, 0.0  ;;  %v496_v62 = vadd.f32 %v1206_v24, %v495_v59  ;;  %v1033_v63 = vpop.f32.mrb[6].mxu0  ;;  %v1255_v2 = vpop.f32.mrb[6].mxu1 }
 0x104   : > { %v675_v3 = vadd.f32 %v674_v48, %v673_v57  ;;  %v776_v4 = vadd.f32 %v775_v61, %v774_v55  ;;  %v612_v5 = vmax.f32 %v504_v58, 0.0  ;;  %v507_v6 = vadd.f32 %v1033_v63, %v1206_v24  ;;  %v498_v7 = vpop.f32.mrb[7].mxu0  ;;  %v1258_v8 = vpop.f32.mrb[7].mxu1 }
 0x105   : > { %v610_v11 = vmax.f32 %v496_v62, 0.0  ;;  %v499_v12 = vadd.f32 %v1206_v24, %v498_v7 }
 0x106   : > { %v778_v14 = vadd.f32 %v777_v9, %v776_v4  ;;  %645 = vst.msk [vmem:[%s1214_s24 + $0x30] sm:$0xff] %vm638_vm0, %v612_v5  ;;  %v677_v15 = vadd.f32 %v676_v10, %v675_v3  ;;  %v613_v18 = vmax.f32 %v507_v6, 0.0  ;;  %v748_v22 = vmul.f32 %v612_v5, %v612_v5 }
 0x107   : > { %643 = vst.msk [vmem:[%s1214_s24 + $0x20] sm:$0xff] %vm638_vm0, %v610_v11  ;;  %v678_v16 = vsel %vm638_vm0, %v610_v11, 0.0  ;;  %v746_v17 = vmul.f32 %v610_v11, %v610_v11  ;;  %v611_v19 = vmax.f32 %v499_v12, 0.0  ;;  %v682_v34 = vsel %vm638_vm0, %v612_v5, 0.0 }
 0x108   : > { %v679_v20 = vadd.f32 %v678_v16, %v677_v15  ;;  %v780_v21 = vadd.f32 %v779_v13, %v778_v14  ;;  %646 = vst.msk [vmem:[%s1214_s24 + $0x38] sm:$0xff] %vm638_vm0, %v613_v18  ;;  %v749_v35 = vmul.f32 %v613_v18, %v613_v18  ;;  %v684_v47 = vsel %vm638_vm0, %v613_v18, 0.0 }
 0x109   : > { %v781_v23 = vsel %vm638_vm0, %v746_v17, 0.0  ;;  %644 = vst.msk [vmem:[%s1214_s24 + $0x28] sm:$0xff] %vm638_vm0, %v611_v19  ;;  %v680_v25 = vsel %vm638_vm0, %v611_v19, 0.0  ;;  %v1036_v26 = vpop.f32.mrb[8].mxu0  ;;  %v1281_v27 = vpop.f32.mrb[8].mxu1  ;;  %v747_v30 = vmul.f32 %v611_v19, %v611_v19  ;;  %v785_v51 = vsel %vm638_vm0, %v748_v22, 0.0 }
 0x10a   : > { %v782_v28 = vadd.f32 %v781_v23, %v780_v21  ;;  %v681_v29 = vadd.f32 %v680_v25, %v679_v20  ;;  %v520_v31 = vadd.f32 %v1036_v26, %v1206_v24  ;;  %v511_v32 = vpop.f32.mrb[9].mxu0  ;;  %v1284_v33 = vpop.f32.mrb[9].mxu1  ;;  %v787_v59 = vsel %vm638_vm0, %v749_v35, 0.0 }
 0x10b   : > { %v512_v36 = vadd.f32 %v1206_v24, %v511_v32  ;;  %v1037_v37 = vpop.f32.mrb[10].mxu0  ;;  %v1288_v39 = vpop.f32.mrb[10].mxu1  ;;  %v783_v41 = vsel %vm638_vm0, %v747_v30, 0.0  ;;  %v568_v19 = vadd.f32 %v1243_v54, %v1206_v24 }
 0x10c   : > { %v683_v40 = vadd.f32 %v682_v34, %v681_v29  ;;  %v616_v43 = vmax.f32 %v520_v31, 0.0  ;;  %v523_v44 = vadd.f32 %v1037_v37, %v1206_v24  ;;  %v514_v45 = vpop.f32.mrb[11].mxu0  ;;  %v1292_v46 = vpop.f32.mrb[11].mxu1  ;;  %v784_v48 = vadd.f32 %v783_v41, %v782_v28 }
 0x10d   : > { %v614_v49 = vmax.f32 %v512_v36, 0.0  ;;  %v515_v50 = vadd.f32 %v1206_v24, %v514_v45  ;;  %v1326_v32 = vmax.f32 %v568_v19, 0.0  ;;  %v560_v36 = vadd.f32 %v1206_v24, %v1247_v60 }
 0x10e   : > { %649 = vst.msk [vmem:[%s1214_s24 + $0x50] sm:$0xff] %vm638_vm0, %v616_v43  ;;  %v685_v52 = vadd.f32 %v684_v47, %v683_v40  ;;  %v617_v53 = vmax.f32 %v523_v44, 0.0  ;;  %v786_v55 = vadd.f32 %v785_v51, %v784_v48  ;;  %v690_v61 = vsel %vm638_vm0, %v616_v43, 0.0 }
 0x10f   : > { %647 = vst.msk [vmem:[%s1214_s24 + $0x40] sm:$0xff] %vm638_vm0, %v614_v49  ;;  %v686_v56 = vsel %vm638_vm0, %v614_v49, 0.0  ;;  %v750_v57 = vmul.f32 %v614_v49, %v614_v49  ;;  %v615_v58 = vmax.f32 %v515_v50, 0.0  ;;  %v752_v9 = vmul.f32 %v616_v43, %v616_v43  ;;  %661 = vst.msk [vmem:[%s1214_s24 + $0xb0] sm:$0xff] %vm638_vm0, %v1326_v32 }
 0x110   : > { %v687_v62 = vadd.f32 %v686_v56, %v685_v52  ;;  %650 = vst.msk [vmem:[%s1214_s24 + $0x58] sm:$0xff] %vm638_vm0, %v617_v53  ;;  %v788_v63 = vadd.f32 %v787_v59, %v786_v55  ;;  %v692_v10 = vsel %vm638_vm0, %v617_v53, 0.0  ;;  %v753_v21 = vmul.f32 %v617_v53, %v617_v53 }
 0x111   : > { %v789_v3 = vsel %vm638_vm0, %v750_v57, 0.0  ;;  %648 = vst.msk [vmem:[%s1214_s24 + $0x48] sm:$0xff] %vm638_vm0, %v615_v58  ;;  %v688_v4 = vsel %vm638_vm0, %v615_v58, 0.0  ;;  %v751_v5 = vmul.f32 %v615_v58, %v615_v58  ;;  %v1040_v6 = vpop.f32.mrb[12].mxu0  ;;  %v1310_v7 = vpop.f32.mrb[12].mxu1  ;;  %v793_v54 = vsel %vm638_vm0, %v752_v9, 0.0 }
 0x112   : > { %v689_v11 = vadd.f32 %v688_v4, %v687_v62  ;;  %v536_v12 = vadd.f32 %v1040_v6, %v1206_v24  ;;  %v527_v13 = vpop.f32.mrb[13].mxu0  ;;  %v1314_v14 = vpop.f32.mrb[13].mxu1  ;;  %v790_v15 = vadd.f32 %v789_v3, %v788_v63  ;;  %v795_v44 = vsel %vm638_vm0, %v753_v21, 0.0 }
 0x113   : > { %v791_v16 = vsel %vm638_vm0, %v751_v5, 0.0  ;;  %v528_v17 = vadd.f32 %v1206_v24, %v527_v13  ;;  %v1041_v18 = vpop.f32.mrb[14].mxu0  ;;  %v1320_v20 = vpop.f32.mrb[14].mxu1  ;;  %v702_v53 = vsel %vm638_vm0, %v1222_v42, 0.0  ;;  %v758_v55 = vmul.f32 %v1222_v42, %v1222_v42 }
 0x114   : > { %v691_v22 = vadd.f32 %v690_v61, %v689_v11  ;;  %v620_v23 = vmax.f32 %v536_v12, 0.0  ;;  %v539_v25 = vadd.f32 %v1041_v18, %v1206_v24  ;;  %v530_v26 = vpop.f32.mrb[15].mxu0  ;;  %v1323_v28 = vpop.f32.mrb[15].mxu1  ;;  %v792_v29 = vadd.f32 %v791_v16, %v790_v15 }
 0x115   : > { %v618_v30 = vmax.f32 %v528_v17, 0.0  ;;  %v531_v31 = vadd.f32 %v1206_v24, %v530_v26  ;;  %v626_v58 = vmax.f32 %v560_v36, 0.0  ;;  %v571_v59 = vadd.f32 %v1255_v2, %v1206_v24 }
 0x116   : > { %653 = vst.msk [vmem:[%s1214_s24 + $0x70] sm:$0xff] %vm638_vm0, %v620_v23  ;;  %v693_v34 = vadd.f32 %v692_v10, %v691_v22  ;;  %v621_v35 = vmax.f32 %v539_v25, 0.0  ;;  %v794_v37 = vadd.f32 %v793_v54, %v792_v29  ;;  %v756_v45 = vmul.f32 %v620_v23, %v620_v23 }
 0x117   : > { %651 = vst.msk [vmem:[%s1214_s24 + $0x60] sm:$0xff] %vm638_vm0, %v618_v30  ;;  %v694_v40 = vsel %vm638_vm0, %v618_v30, 0.0  ;;  %v754_v41 = vmul.f32 %v618_v30, %v618_v30  ;;  %v619_v43 = vmax.f32 %v531_v31, 0.0  ;;  %v698_v51 = vsel %vm638_vm0, %v620_v23, 0.0  ;;  %659 = vst.msk [vmem:[%s1214_s24 + $0xa0] sm:$0xff] %vm638_vm0, %v626_v58 }
 0x118   : > { %v695_v47 = vadd.f32 %v694_v40, %v693_v34  ;;  %654 = vst.msk [vmem:[%s1214_s24 + $0x78] sm:$0xff] %vm638_vm0, %v621_v35  ;;  %v796_v48 = vadd.f32 %v795_v44, %v794_v37  ;;  %v757_v61 = vmul.f32 %v621_v35, %v621_v35  ;;  %v563_v63 = vadd.f32 %v1206_v24, %v1258_v8 }
 0x119   : > { %v797_v49 = vsel %vm638_vm0, %v754_v41, 0.0  ;;  %652 = vst.msk [vmem:[%s1214_s24 + $0x68] sm:$0xff] %vm638_vm0, %v619_v43  ;;  %v696_v60 = vsel %vm638_vm0, %v619_v43, 0.0  ;;  %v755_v50 = vmul.f32 %v619_v43, %v619_v43  ;;  %v584_v3 = vadd.f32 %v1281_v27, %v1206_v24 }
 0x11a   : > { %v697_v52 = vadd.f32 %v696_v60, %v695_v47  ;;  %v798_v56 = vadd.f32 %v797_v49, %v796_v48  ;;  %v801_v4 = vsel %vm638_vm0, %v756_v45, 0.0  ;;  %v700_v42 = vsel %vm638_vm0, %v621_v35, 0.0 }
 0x11b   : > { %v799_v57 = vsel %vm638_vm0, %v755_v50, 0.0  ;;  %v1362_v6 = vmax.f32 %v571_v59, 0.0  ;;  %v627_v9 = vmax.f32 %v563_v63, 0.0  ;;  %v1364_v10 = vmax.f32 %v584_v3, 0.0 }
 0x11c   : > { %v699_v62 = vadd.f32 %v698_v51, %v697_v52  ;;  %v800_v5 = vadd.f32 %v799_v57, %v798_v56  ;;  %v576_v8 = vadd.f32 %v1206_v24, %v1284_v33  ;;  %v759_v27 = vmul.f32 %v1253_v1, %v1253_v1 }
 0x11d   : > { %662 = vst.msk [vmem:[%s1214_s24 + $0xb8] sm:$0xff] %vm638_vm0, %v1362_v6  ;;  %v803_v12 = vsel %vm638_vm0, %v757_v61, 0.0  ;;  %v706_v13 = vsel %vm638_vm0, %v1219_v38, 0.0  ;;  %v805_v16 = vsel %vm638_vm0, %v758_v55, 0.0  ;;  %660 = vst.msk [vmem:[%s1214_s24 + $0xa8] sm:$0xff] %vm638_vm0, %v627_v9  ;;  %v760_v33 = vmul.f32 %v1219_v38, %v1219_v38 }
 0x11e   : > { %v701_v2 = vadd.f32 %v700_v42, %v699_v62  ;;  %v802_v11 = vadd.f32 %v801_v4, %v800_v5  ;;  %665 = vst.msk [vmem:[%s1214_s24 + $0xd0] sm:$0xff] %vm638_vm0, %v1364_v10  ;;  %v704_v18 = vsel %vm638_vm0, %v1253_v1, 0.0  ;;  %v630_v19 = vmax.f32 %v576_v8, 0.0 }
 0x11f   : > { %v761_v21 = vmul.f32 %v1251_v0, %v1251_v0  ;;  %v587_v23 = vadd.f32 %v1288_v39, %v1206_v24  ;;  %v579_v25 = vadd.f32 %v1206_v24, %v1292_v46  ;;  %v708_v38 = vsel %vm638_vm0, %v1251_v0, 0.0 }
 0x120   : > { %v703_v15 = vadd.f32 %v702_v53, %v701_v2  ;;  %v804_v17 = vadd.f32 %v803_v12, %v802_v11  ;;  %v807_v29 = vsel %vm638_vm0, %v759_v27, 0.0  ;;  %v762_v1 = vmul.f32 %v626_v58, %v626_v58  ;;  %663 = vst.msk [vmem:[%s1214_s24 + $0xc0] sm:$0xff] %vm638_vm0, %v630_v19 }
 0x121   : > { %v633_v31 = vmax.f32 %v587_v23, 0.0  ;;  %v631_v54 = vmax.f32 %v579_v25, 0.0  ;;  %v600_v39 = vadd.f32 %v1310_v7, %v1206_v24  ;;  %v710_v46 = vsel %vm638_vm0, %v626_v58, 0.0 }
 0x122   : > { %v705_v22 = vadd.f32 %v704_v18, %v703_v15  ;;  %v806_v26 = vadd.f32 %v805_v16, %v804_v17  ;;  %v592_v35 = vadd.f32 %v1206_v24, %v1314_v14  ;;  %v603_v0 = vadd.f32 %v1320_v20, %v1206_v24 }
 0x123   : > { %v809_v36 = vsel %vm638_vm0, %v760_v33, 0.0  ;;  %v811_v37 = vsel %vm638_vm0, %v761_v21, 0.0  ;;  %666 = vst.msk [vmem:[%s1214_s24 + $0xd8] sm:$0xff] %vm638_vm0, %v633_v31  ;;  %664 = vst.msk [vmem:[%s1214_s24 + $0xc8] sm:$0xff] %vm638_vm0, %v631_v54  ;;  %v813_v41 = vsel %vm638_vm0, %v762_v1, 0.0  ;;  %v636_v43 = vmax.f32 %v600_v39, 0.0 }
 0x124   : > { %v707_v30 = vadd.f32 %v706_v13, %v705_v22  ;;  %v808_v34 = vadd.f32 %v807_v29, %v806_v26  ;;  %v634_v14 = vmax.f32 %v592_v35, 0.0  ;;  %v763_v45 = vmul.f32 %v627_v9, %v627_v9 }
 0x125   : > { %v637_v20 = vmax.f32 %v603_v0, 0.0  ;;  %v595_v47 = vadd.f32 %v1206_v24, %v1323_v28  ;;  %v712_v49 = vsel %vm638_vm0, %v627_v9, 0.0  ;;  %669 = vst.msk [vmem:[%s1214_s24 + $0xf0] sm:$0xff] %vm638_vm0, %v636_v43  ;;  %v772_v60 = vmul.f32 %v636_v43, %v636_v43 }
 0x126   : > { %v709_v40 = vadd.f32 %v708_v38, %v707_v30  ;;  %v810_v7 = vadd.f32 %v809_v36, %v808_v34  ;;  %667 = vst.msk [vmem:[%s1214_s24 + $0xe0] sm:$0xff] %vm638_vm0, %v634_v14  ;;  %v714_v50 = vsel %vm638_vm0, %v1326_v32, 0.0  ;;  %v764_v51 = vmul.f32 %v1326_v32, %v1326_v32 }
 0x127   : > { %670 = vst.msk [vmem:[%s1214_s24 + $0xf8] sm:$0xff] %vm638_vm0, %v637_v20  ;;  %v833_v24 = vsel %vm638_vm0, %v772_v60, 0.0  ;;  %v773_v28 = vmul.f32 %v637_v20, %v637_v20  ;;  %v635_v55 = vmax.f32 %v595_v47, 0.0  ;;  %v765_v56 = vmul.f32 %v1362_v6, %v1362_v6 }
 0x128   : > { %v711_v44 = vadd.f32 %v710_v46, %v709_v40  ;;  %v812_v48 = vadd.f32 %v811_v37, %v810_v7  ;;  %v815_v58 = vsel %vm638_vm0, %v763_v45, 0.0  ;;  %v766_v59 = vmul.f32 %v630_v19, %v630_v19 }
 0x129   : > { %v716_v61 = vsel %vm638_vm0, %v1362_v6, 0.0  ;;  %v718_v32 = vsel %vm638_vm0, %v630_v19, 0.0  ;;  %v835_v63 = vsel %vm638_vm0, %v773_v28, 0.0  ;;  %668 = vst.msk [vmem:[%s1214_s24 + $0xe8] sm:$0xff] %vm638_vm0, %v635_v55  ;;  %v817_v3 = vsel %vm638_vm0, %v764_v51, 0.0 }
 0x12a   : > { %v713_v52 = vadd.f32 %v712_v49, %v711_v44  ;;  %v814_v53 = vadd.f32 %v813_v41, %v812_v48  ;;  %v819_v5 = vsel %vm638_vm0, %v765_v56, 0.0  ;;  %v821_v9 = vsel %vm638_vm0, %v766_v59, 0.0 }
 0x12b   : > { %v767_v8 = vmul.f32 %v631_v54, %v631_v54  ;;  %v720_v6 = vsel %vm638_vm0, %v631_v54, 0.0  ;;  %v768_v27 = vmul.f32 %v1364_v10, %v1364_v10  ;;  %v722_v13 = vsel %vm638_vm0, %v1364_v10, 0.0 }
 0x12c   : > { %v715_v57 = vadd.f32 %v714_v50, %v713_v52  ;;  %v816_v62 = vadd.f32 %v815_v58, %v814_v53  ;;  %v769_v16 = vmul.f32 %v633_v31, %v633_v31  ;;  %v770_v18 = vmul.f32 %v634_v14, %v634_v14 }
 0x12d   : > { %v823_v17 = vsel %vm638_vm0, %v767_v8, 0.0  ;;  %v724_v19 = vsel %vm638_vm0, %v633_v31, 0.0  ;;  %v726_v22 = vsel %vm638_vm0, %v634_v14, 0.0  ;;  %v825_v23 = vsel %vm638_vm0, %v768_v27, 0.0 }
 0x12e   : > { %v717_v4 = vadd.f32 %v716_v61, %v715_v57  ;;  %v818_v42 = vadd.f32 %v817_v3, %v816_v62  ;;  %v827_v38 = vsel %vm638_vm0, %v769_v16, 0.0  ;;  %v829_v10 = vsel %vm638_vm0, %v770_v18, 0.0 }
 0x12f   : > { %v771_v1 = vmul.f32 %v635_v55, %v635_v55  ;;  %v728_v54 = vsel %vm638_vm0, %v635_v55, 0.0  ;;  %v730_v31 = vsel %vm638_vm0, %v636_v43, 0.0  ;;  %v732_v0 = vsel %vm638_vm0, %v637_v20, 0.0 }
 0x130   : > { %v719_v2 = vadd.f32 %v718_v32, %v717_v4  ;;  %v820_v11 = vadd.f32 %v819_v5, %v818_v42 }
 0x131   : > { %v831_v35 = vsel %vm638_vm0, %v771_v1, 0.0 }
 0x132   : > { %v721_v12 = vadd.f32 %v720_v6, %v719_v2  ;;  %v822_v15 = vadd.f32 %v821_v9, %v820_v11 }
 0x134   : > { %v723_v33 = vadd.f32 %v722_v13, %v721_v12  ;;  %v824_v21 = vadd.f32 %v823_v17, %v822_v15 }
 0x136   : > { %v725_v25 = vadd.f32 %v724_v19, %v723_v33  ;;  %v826_v26 = vadd.f32 %v825_v23, %v824_v21 }
 0x138   : > { %v727_v29 = vadd.f32 %v726_v22, %v725_v25  ;;  %v828_v30 = vadd.f32 %v827_v38, %v826_v26 }
 0x13a   : > { %v729_v39 = vadd.f32 %v728_v54, %v727_v29  ;;  %v830_v34 = vadd.f32 %v829_v10, %v828_v30 }
 0x13c   : > { %v731_v46 = vadd.f32 %v730_v31, %v729_v39  ;;  %v832_v36 = vadd.f32 %v831_v35, %v830_v34 }
 0x13e   : > { %v733_v37 = vadd.f32 %v732_v0, %v731_v46  ;;  %v834_v40 = vadd.f32 %v833_v24, %v832_v36 }
 0x140   : > { %v734_v7 = vrot.slane %v733_v37, 4  ;;  %v836_v41 = vadd.f32 %v835_v63, %v834_v40 }
 0x142   : > { %v735_v14 = vadd.f32 %v734_v7, %v733_v37  ;;  %v837_v44 = vrot.slane %v836_v41, 4 }
 0x144   : > { %v736_v45 = vrot.slane %v735_v14, 2  ;;  %v838_v47 = vadd.f32 %v837_v44, %v836_v41 }
 0x146   : > { %v737_v48 = vadd.f32 %v736_v45, %v735_v14  ;;  %v839_v49 = vrot.slane %v838_v47, 2 }
 0x148   : > { %v738_v43 = vrot.slane %v737_v48, 1  ;;  %v840_v20 = vadd.f32 %v839_v49, %v838_v47 }
 0x14a   : > { %v739_v60 = vadd.f32 %v738_v43, %v737_v48  ;;  %v841_v50 = vrot.slane %v840_v20, 1 }
 0x14c   : > { %741 = vst.msk [vmem:[%s241_s26] sm:$0x1] %vm740_vm1, %v739_v60  ;;  %v842_v51 = vadd.f32 %v841_v50, %v840_v20 }
 0x14e   : > { %843 = vst.msk [vmem:[%s244_s29] sm:$0x1] %vm740_vm1, %v842_v51 }
 0x14f PF: > { %s16_s18 = sadd.s32 1, %s1112_s18  }
 0x150   : > { %p13_p5 = scmp.ge.s32.totalorder %s16_s18, 4  }
 0x152   :  { %15 = sbr.rel (!%p13_p5) target bundleno = 1 (0x1), region = 86 }

</bundles_post_ra>
